<compile_context>
chip_gen: v5e
topology: v5e:2x2
jax: 0.10.0
libtpu: 0.0.40
codegen_flags: <defaults>
</compile_context>

<pallas_src>
import jax
import jax.numpy as jnp
from jax.experimental import pallas as pl
from jax.experimental.pallas import tpu as pltpu

CMP_DIM = 10
N_PRIMITIVES = 3  # ball_acc, ball_pos_z, ball_speed


def _align_differential(x):
    """AlignDifferential along axis 1 (time): same-length central difference with
    linear extrapolation padding at both ends.  x: [TB, T, S]."""
    first = 2.0 * x[:, 0:1, :] - x[:, 1:2, :]
    last = 2.0 * x[:, -1:, :] - x[:, -2:-1, :]
    padded = jnp.concatenate([first, x, last], axis=1)       # [TB, T+2, S]
    return (padded[:, 2:, :] - padded[:, :-2, :]) * 0.5


def _nullary_prims_kernel(ball_ref, scale_ref, bias_ref, out_ref):
    """One tile of TB batch rows, full time axis.

    ball_ref:  [TB, T, S]   agent-0 ("ball") states
    scale_ref: [3, 1, C]    pre-folded (1 + beta) / sigma per primitive
    bias_ref:  [3, 1, C]    pre-folded mu * (1 + beta) / sigma per primitive
    out_ref:   [TB, T, 3*C]
    """
    ball = ball_ref[...]                                     # [TB, T, S]
    vel = _align_differential(ball)
    acc = _align_differential(vel)

    x_acc = jnp.sqrt(jnp.sum(acc * acc, axis=-1, keepdims=True))      # [TB, T, 1]
    x_posz = ball[:, :, 2:3]                                          # [TB, T, 1]
    x_speed = jnp.sqrt(jnp.sum(ball * ball, axis=-1, keepdims=True))  # [TB, T, 1]

    outs = []
    for k, x in enumerate((x_acc, x_posz, x_speed)):
        z = x * scale_ref[k] - bias_ref[k]                   # [TB, T, C]
        # sigmoid via a single tanh EUP push (numerically == jax.nn.sigmoid)
        outs.append(0.5 * (jnp.tanh(0.5 * z) + 1.0))
    out_ref[...] = jnp.concatenate(outs, axis=-1)            # one dense store


def nullary_primitives_predefined_v2(states, mus, sigmas, beta=0.0, *, block_b=8):
    """states: [B, T, N, S] -> [B, T, 3 * cmp_dim] (float32).

    mus / sigmas: length-3 sequences of [cmp_dim] Inequality parameters for
    (ball_acc, ball_pos_z, ball_speed).
    """
    B, T, N, S = states.shape
    C = mus[0].shape[0]

    # Glue: only agent 0 feeds the nullary primitives -> slice once (cuts DMA by N).
    ball = states[:, :, 0, :].astype(jnp.float32)            # [B, T, S]

    # Pre-fold:  (x - mu) / sigma * (1 + beta)  ==  x * scale - bias
    mu = jnp.stack(list(mus)).astype(jnp.float32)            # [3, C]
    sigma = jnp.stack(list(sigmas)).astype(jnp.float32)      # [3, C]
    inv = (1.0 + float(beta)) / sigma                        # [3, C]
    scale = inv.reshape(N_PRIMITIVES, 1, C)
    bias = (mu * inv).reshape(N_PRIMITIVES, 1, C)

    tb = min(int(block_b), B)                                # sweep for large B
    grid = (pl.cdiv(B, tb),)

    out = pl.pallas_call(
        _nullary_prims_kernel,
        out_shape=jax.ShapeDtypeStruct((B, T, N_PRIMITIVES * C), jnp.float32),
        grid=grid,
        in_specs=[
            pl.BlockSpec((tb, T, S), lambda i: (i, 0, 0)),
            pl.BlockSpec((N_PRIMITIVES, 1, C), lambda i: (0, 0, 0)),
            pl.BlockSpec((N_PRIMITIVES, 1, C), lambda i: (0, 0, 0)),
        ],
        out_specs=pl.BlockSpec((tb, T, N_PRIMITIVES * C), lambda i: (i, 0, 0)),
        compiler_params=pltpu.CompilerParams(
            dimension_semantics=("parallel",)),
    )(ball, scale, bias)
    return out


# ----------------------- pure-JAX reference (mirrors torch) -----------------------

def _align_differential_ref(x):
    padded = jnp.concatenate(
        [2.0 * x[:, 0:1] - x[:, 1:2], x, 2.0 * x[:, -1:] - x[:, -2:-1]], axis=1)
    return (padded[:, 2:] - padded[:, :-2]) * 0.5


def _reference(states, mus, sigmas, beta=0.0):
    states = states.astype(jnp.float32)
    vel = _align_differential_ref(states)
    acc = _align_differential_ref(vel)
    inputs = [
        jnp.linalg.norm(acc[:, :, 0, :], axis=-1),           # ball_acc
        states[:, :, 0, 2],                                  # ball_pos_z
        jnp.linalg.norm(states[:, :, 0, :], axis=-1),        # ball_speed
    ]
    outs = [jax.nn.sigmoid((x[..., None] - m) / s * (1.0 + beta))
            for x, m, s in zip(inputs, mus, sigmas)]
    return jnp.concatenate(outs, axis=-1)


if __name__ == "__main__":
    key = jax.random.PRNGKey(0)
    k_states, k_mu1, k_mu2, k_mu3 = jax.random.split(key, 4)

    B, T, N, S = 2, 8, 4, 6   # batch, length, n_agents, state_dim
    states = jax.random.normal(k_states, (B, T, N, S), dtype=jnp.float32)

    # Inequality parameters: ball_acc/ball_speed 'normal', ball_pos_z 'uniform'
    mu_acc = jax.random.normal(k_mu1, (CMP_DIM,), dtype=jnp.float32)
    mu_posz = jax.random.uniform(k_mu2, (CMP_DIM,), dtype=jnp.float32)
    mu_speed = jax.random.normal(k_mu3, (CMP_DIM,), dtype=jnp.float32)
    sigma = jnp.ones((CMP_DIM,), dtype=jnp.float32)
    mus = (mu_acc, mu_posz, mu_speed)
    sigmas = (sigma, sigma, sigma)

    out = nullary_primitives_predefined_v2(states, mus, sigmas, beta=0.0)
    out = jax.block_until_ready(out)

    ref = _reference(states, mus, sigmas, beta=0.0)
    assert out.shape == (B, T, N_PRIMITIVES * CMP_DIM), out.shape
    assert jnp.allclose(out, ref, atol=1e-5, rtol=1e-5), "mismatch vs reference"

    print("KERNEL_OK")
</pallas_src>

<mosaic_0001>
module attributes {stable_mosaic.version = 11 : i64} {
  func.func @_nullary_prims_kernel(%arg0: i32, %arg1: memref<2x8x6xf32, #tpu.memory_space<vmem>>, %arg2: memref<3x1x10xf32, #tpu.memory_space<vmem>>, %arg3: memref<3x1x10xf32, #tpu.memory_space<vmem>>, %arg4: memref<2x8x30xf32, #tpu.memory_space<vmem>>) attributes {dimension_semantics = [#tpu.dimension_semantics<parallel>], iteration_bounds = array<i64: 1>, scalar_prefetch = 0 : i64, scratch_operands = 0 : i64, tpu.core_type = #tpu.core_type<tc>, window_params = [{transform_indices = @transform_0, window_bounds = array<i64: 2, 8, 6>}, {pipeline_mode = #tpu.pipeline_mode<synchronous>, transform_indices = @transform_1, window_bounds = array<i64: 3, 1, 10>}, {pipeline_mode = #tpu.pipeline_mode<synchronous>, transform_indices = @transform_2, window_bounds = array<i64: 3, 1, 10>}, {transform_indices = @transform_3, window_bounds = array<i64: 2, 8, 30>}]} {
    %c0 = arith.constant 0 : index
    %c0_0 = arith.constant 0 : index
    %c0_1 = arith.constant 0 : index
    %0 = vector.load %arg1[%c0, %c0_0, %c0_1] : memref<2x8x6xf32, #tpu.memory_space<vmem>>, vector<2x8x6xf32>
    %1 = vector.extract_strided_slice %0 {offsets = [0, 0, 0], sizes = [2, 1, 6], strides = [1, 1, 1]} : vector<2x8x6xf32> to vector<2x1x6xf32>
    %cst = arith.constant 2.000000e+00 : f32
    %2 = vector.broadcast %cst : f32 to vector<2x1x6xf32>
    %3 = arith.mulf %2, %1 : vector<2x1x6xf32>
    %4 = vector.extract_strided_slice %0 {offsets = [0, 1, 0], sizes = [2, 1, 6], strides = [1, 1, 1]} : vector<2x8x6xf32> to vector<2x1x6xf32>
    %5 = arith.subf %3, %4 : vector<2x1x6xf32>
    %6 = vector.extract_strided_slice %0 {offsets = [0, 7, 0], sizes = [2, 1, 6], strides = [1, 1, 1]} : vector<2x8x6xf32> to vector<2x1x6xf32>
    %cst_2 = arith.constant 2.000000e+00 : f32
    %7 = vector.broadcast %cst_2 : f32 to vector<2x1x6xf32>
    %8 = arith.mulf %7, %6 : vector<2x1x6xf32>
    %9 = vector.extract_strided_slice %0 {offsets = [0, 6, 0], sizes = [2, 1, 6], strides = [1, 1, 1]} : vector<2x8x6xf32> to vector<2x1x6xf32>
    %10 = arith.subf %8, %9 : vector<2x1x6xf32>
    %11 = tpu.concatenate %5, %0, %10 in 1 : vector<2x1x6xf32>, vector<2x8x6xf32>, vector<2x1x6xf32> -> vector<2x10x6xf32>
    %12 = vector.extract_strided_slice %11 {offsets = [0, 2, 0], sizes = [2, 8, 6], strides = [1, 1, 1]} : vector<2x10x6xf32> to vector<2x8x6xf32>
    %13 = vector.extract_strided_slice %11 {offsets = [0, 0, 0], sizes = [2, 8, 6], strides = [1, 1, 1]} : vector<2x10x6xf32> to vector<2x8x6xf32>
    %14 = arith.subf %12, %13 : vector<2x8x6xf32>
    %cst_3 = arith.constant 5.000000e-01 : f32
    %15 = vector.broadcast %cst_3 : f32 to vector<2x8x6xf32>
    %16 = arith.mulf %14, %15 : vector<2x8x6xf32>
    %17 = vector.extract_strided_slice %16 {offsets = [0, 0, 0], sizes = [2, 1, 6], strides = [1, 1, 1]} : vector<2x8x6xf32> to vector<2x1x6xf32>
    %cst_4 = arith.constant 2.000000e+00 : f32
    %18 = vector.broadcast %cst_4 : f32 to vector<2x1x6xf32>
    %19 = arith.mulf %18, %17 : vector<2x1x6xf32>
    %20 = vector.extract_strided_slice %16 {offsets = [0, 1, 0], sizes = [2, 1, 6], strides = [1, 1, 1]} : vector<2x8x6xf32> to vector<2x1x6xf32>
    %21 = arith.subf %19, %20 : vector<2x1x6xf32>
    %22 = vector.extract_strided_slice %16 {offsets = [0, 7, 0], sizes = [2, 1, 6], strides = [1, 1, 1]} : vector<2x8x6xf32> to vector<2x1x6xf32>
    %cst_5 = arith.constant 2.000000e+00 : f32
    %23 = vector.broadcast %cst_5 : f32 to vector<2x1x6xf32>
    %24 = arith.mulf %23, %22 : vector<2x1x6xf32>
    %25 = vector.extract_strided_slice %16 {offsets = [0, 6, 0], sizes = [2, 1, 6], strides = [1, 1, 1]} : vector<2x8x6xf32> to vector<2x1x6xf32>
    %26 = arith.subf %24, %25 : vector<2x1x6xf32>
    %27 = tpu.concatenate %21, %16, %26 in 1 : vector<2x1x6xf32>, vector<2x8x6xf32>, vector<2x1x6xf32> -> vector<2x10x6xf32>
    %28 = vector.extract_strided_slice %27 {offsets = [0, 2, 0], sizes = [2, 8, 6], strides = [1, 1, 1]} : vector<2x10x6xf32> to vector<2x8x6xf32>
    %29 = vector.extract_strided_slice %27 {offsets = [0, 0, 0], sizes = [2, 8, 6], strides = [1, 1, 1]} : vector<2x10x6xf32> to vector<2x8x6xf32>
    %30 = arith.subf %28, %29 : vector<2x8x6xf32>
    %cst_6 = arith.constant 5.000000e-01 : f32
    %31 = vector.broadcast %cst_6 : f32 to vector<2x8x6xf32>
    %32 = arith.mulf %30, %31 : vector<2x8x6xf32>
    %33 = arith.mulf %32, %32 : vector<2x8x6xf32>
    %cst_7 = arith.constant dense<0.000000e+00> : vector<2x8xf32>
    %34 = vector.multi_reduction <add>, %33, %cst_7 [2] : vector<2x8x6xf32> to vector<2x8xf32>
    %35 = vector.shape_cast %34 : vector<2x8xf32> to vector<2x8x1xf32>
    %36 = math.sqrt %35 : vector<2x8x1xf32>
    %37 = vector.extract_strided_slice %0 {offsets = [0, 0, 2], sizes = [2, 8, 1], strides = [1, 1, 1]} : vector<2x8x6xf32> to vector<2x8x1xf32>
    %38 = arith.mulf %0, %0 : vector<2x8x6xf32>
    %cst_8 = arith.constant dense<0.000000e+00> : vector<2x8xf32>
    %39 = vector.multi_reduction <add>, %38, %cst_8 [2] : vector<2x8x6xf32> to vector<2x8xf32>
    %40 = vector.shape_cast %39 : vector<2x8xf32> to vector<2x8x1xf32>
    %41 = math.sqrt %40 : vector<2x8x1xf32>
    %c0_9 = arith.constant 0 : index
    %c0_10 = arith.constant 0 : index
    %c0_11 = arith.constant 0 : index
    %42 = vector.load %arg2[%c0_9, %c0_10, %c0_11] : memref<3x1x10xf32, #tpu.memory_space<vmem>>, vector<1x1x10xf32>
    %43 = vector.shape_cast %42 : vector<1x1x10xf32> to vector<1x10xf32>
    %44 = vector.shape_cast %43 : vector<1x10xf32> to vector<1x1x10xf32>
    %45 = vector.broadcast %36 : vector<2x8x1xf32> to vector<2x8x10xf32>
    %46 = vector.broadcast %44 : vector<1x1x10xf32> to vector<2x8x10xf32>
    %47 = arith.mulf %45, %46 : vector<2x8x10xf32>
    %c0_12 = arith.constant 0 : index
    %c0_13 = arith.constant 0 : index
    %c0_14 = arith.constant 0 : index
    %48 = vector.load %arg3[%c0_12, %c0_13, %c0_14] : memref<3x1x10xf32, #tpu.memory_space<vmem>>, vector<1x1x10xf32>
    %49 = vector.shape_cast %48 : vector<1x1x10xf32> to vector<1x10xf32>
    %50 = vector.shape_cast %49 : vector<1x10xf32> to vector<1x1x10xf32>
    %51 = vector.broadcast %50 : vector<1x1x10xf32> to vector<2x8x10xf32>
    %52 = arith.subf %47, %51 : vector<2x8x10xf32>
    %cst_15 = arith.constant 5.000000e-01 : f32
    %53 = vector.broadcast %cst_15 : f32 to vector<2x8x10xf32>
    %54 = arith.mulf %53, %52 : vector<2x8x10xf32>
    %55 = math.tanh %54 : vector<2x8x10xf32>
    %cst_16 = arith.constant 1.000000e+00 : f32
    %56 = vector.broadcast %cst_16 : f32 to vector<2x8x10xf32>
    %57 = arith.addf %55, %56 : vector<2x8x10xf32>
    %cst_17 = arith.constant 5.000000e-01 : f32
    %58 = vector.broadcast %cst_17 : f32 to vector<2x8x10xf32>
    %59 = arith.mulf %58, %57 : vector<2x8x10xf32>
    %c1 = arith.constant 1 : index
    %c0_18 = arith.constant 0 : index
    %c0_19 = arith.constant 0 : index
    %60 = vector.load %arg2[%c1, %c0_18, %c0_19] : memref<3x1x10xf32, #tpu.memory_space<vmem>>, vector<1x1x10xf32>
    %61 = vector.shape_cast %60 : vector<1x1x10xf32> to vector<1x10xf32>
    %62 = vector.shape_cast %61 : vector<1x10xf32> to vector<1x1x10xf32>
    %63 = vector.broadcast %37 : vector<2x8x1xf32> to vector<2x8x10xf32>
    %64 = vector.broadcast %62 : vector<1x1x10xf32> to vector<2x8x10xf32>
    %65 = arith.mulf %63, %64 : vector<2x8x10xf32>
    %c1_20 = arith.constant 1 : index
    %c0_21 = arith.constant 0 : index
    %c0_22 = arith.constant 0 : index
    %66 = vector.load %arg3[%c1_20, %c0_21, %c0_22] : memref<3x1x10xf32, #tpu.memory_space<vmem>>, vector<1x1x10xf32>
    %67 = vector.shape_cast %66 : vector<1x1x10xf32> to vector<1x10xf32>
    %68 = vector.shape_cast %67 : vector<1x10xf32> to vector<1x1x10xf32>
    %69 = vector.broadcast %68 : vector<1x1x10xf32> to vector<2x8x10xf32>
    %70 = arith.subf %65, %69 : vector<2x8x10xf32>
    %cst_23 = arith.constant 5.000000e-01 : f32
    %71 = vector.broadcast %cst_23 : f32 to vector<2x8x10xf32>
    %72 = arith.mulf %71, %70 : vector<2x8x10xf32>
    %73 = math.tanh %72 : vector<2x8x10xf32>
    %cst_24 = arith.constant 1.000000e+00 : f32
    %74 = vector.broadcast %cst_24 : f32 to vector<2x8x10xf32>
    %75 = arith.addf %73, %74 : vector<2x8x10xf32>
    %cst_25 = arith.constant 5.000000e-01 : f32
    %76 = vector.broadcast %cst_25 : f32 to vector<2x8x10xf32>
    %77 = arith.mulf %76, %75 : vector<2x8x10xf32>
    %c2 = arith.constant 2 : index
    %c0_26 = arith.constant 0 : index
    %c0_27 = arith.constant 0 : index
    %78 = vector.load %arg2[%c2, %c0_26, %c0_27] : memref<3x1x10xf32, #tpu.memory_space<vmem>>, vector<1x1x10xf32>
    %79 = vector.shape_cast %78 : vector<1x1x10xf32> to vector<1x10xf32>
    %80 = vector.shape_cast %79 : vector<1x10xf32> to vector<1x1x10xf32>
    %81 = vector.broadcast %41 : vector<2x8x1xf32> to vector<2x8x10xf32>
    %82 = vector.broadcast %80 : vector<1x1x10xf32> to vector<2x8x10xf32>
    %83 = arith.mulf %81, %82 : vector<2x8x10xf32>
    %c2_28 = arith.constant 2 : index
    %c0_29 = arith.constant 0 : index
    %c0_30 = arith.constant 0 : index
    %84 = vector.load %arg3[%c2_28, %c0_29, %c0_30] : memref<3x1x10xf32, #tpu.memory_space<vmem>>, vector<1x1x10xf32>
    %85 = vector.shape_cast %84 : vector<1x1x10xf32> to vector<1x10xf32>
    %86 = vector.shape_cast %85 : vector<1x10xf32> to vector<1x1x10xf32>
    %87 = vector.broadcast %86 : vector<1x1x10xf32> to vector<2x8x10xf32>
    %88 = arith.subf %83, %87 : vector<2x8x10xf32>
    %cst_31 = arith.constant 5.000000e-01 : f32
    %89 = vector.broadcast %cst_31 : f32 to vector<2x8x10xf32>
    %90 = arith.mulf %89, %88 : vector<2x8x10xf32>
    %91 = math.tanh %90 : vector<2x8x10xf32>
    %cst_32 = arith.constant 1.000000e+00 : f32
    %92 = vector.broadcast %cst_32 : f32 to vector<2x8x10xf32>
    %93 = arith.addf %91, %92 : vector<2x8x10xf32>
    %cst_33 = arith.constant 5.000000e-01 : f32
    %94 = vector.broadcast %cst_33 : f32 to vector<2x8x10xf32>
    %95 = arith.mulf %94, %93 : vector<2x8x10xf32>
    %96 = tpu.concatenate %59, %77, %95 in 2 : vector<2x8x10xf32>, vector<2x8x10xf32>, vector<2x8x10xf32> -> vector<2x8x30xf32>
    %c0_34 = arith.constant 0 : index
    %c0_35 = arith.constant 0 : index
    %c0_36 = arith.constant 0 : index
    %97 = vector.load %arg4[%c0_34, %c0_35, %c0_36] : memref<2x8x30xf32, #tpu.memory_space<vmem>>, vector<2x8x30xf32>
    tpu.vector_store %arg4[%c0_34, %c0_35, %c0_36], %96 {strides = array<i32>} : memref<2x8x30xf32, #tpu.memory_space<vmem>>, vector<2x8x30xf32>,
    return
  }
  func.func @transform_0(%arg0: i32) -> (i32, i32, i32) {
    %c0_i32 = arith.constant 0 : i32
    %c0_i32_0 = arith.constant 0 : i32
    %c0_i32_1 = arith.constant 0 : i32
    return %arg0, %c0_i32, %c0_i32_0 : i32, i32, i32
  }
  func.func @transform_1(%arg0: i32) -> (i32, i32, i32) {
    %c0_i32 = arith.constant 0 : i32
    %c0_i32_0 = arith.constant 0 : i32
    %c0_i32_1 = arith.constant 0 : i32
    %c0_i32_2 = arith.constant 0 : i32
    return %c0_i32, %c0_i32_0, %c0_i32_1 : i32, i32, i32
  }
  func.func @transform_2(%arg0: i32) -> (i32, i32, i32) {
    %c0_i32 = arith.constant 0 : i32
    %c0_i32_0 = arith.constant 0 : i32
    %c0_i32_1 = arith.constant 0 : i32
    %c0_i32_2 = arith.constant 0 : i32
    return %c0_i32, %c0_i32_0, %c0_i32_1 : i32, i32, i32
  }
  func.func @transform_3(%arg0: i32) -> (i32, i32, i32) {
    %c0_i32 = arith.constant 0 : i32
    %c0_i32_0 = arith.constant 0 : i32
    %c0_i32_1 = arith.constant 0 : i32
    return %arg0, %c0_i32, %c0_i32_0 : i32, i32, i32
  }
}

</mosaic_0001>

<bundles_post_ra>
// kernel: tpu_custom_call.1
= control target key start
LH: loop header
LB: loop body
LE: loop exit
PB: predicated region body
PF: predicated region fallthrough
CT: control target
= control target key end

     0   :  { %vm179_vm0 = vcmask 48128   ;;  %v420_v5 = vmov 2   ;;  %vm39_vm1 = vcmask 1040384   ;;  %s497_s0 = inlined_call_operand.vmem [shape: f32[2,8,6], index: 0, kind: input, shape index: {}]   ;;  %s498_s1 = inlined_call_operand.vmem [shape: f32[3,1,10], index: 1, kind: input, shape index: {}]   ;;  %s499_s2 = inlined_call_operand.vmem [shape: f32[3,1,10], index: 2, kind: input, shape index: {}]   ;;  %s500_s3 = inlined_call_operand.hbm [shape: f32[2,8,30], index: 3, kind: output, shape index: {}]  }
   0x1   :  { %v15_v0 = vld [vmem:[%s497_s0] sm:$0xff]  ;;  %358 = vset.pattern.permute.xlu1 %v420_v5  ;;  %v16_v6 = vld [vmem:[%s497_s0 + $0x8] sm:$0xff]  ;;  %359 = vset.pattern.permute.xlu0 %v420_v5 }
   0x2   :  { %v177_v1 = vmul.f32 %v15_v0, %v15_v0  ;;  %v17_v2 = vmul.f32 2.0, %v15_v0  ;;  %v21_v3 = vrot.slane %v15_v0, 1  ;;  %v27_v4 = vrot.slane %v15_v0, 7  ;;  %245 = vperm.xlu1 %358, %v15_v0  }
   0x3   :  { %v18_v7 = vmul.f32 2.0, %v16_v6  ;;  %v22_v8 = vrot.slane %v16_v6, 1  ;;  %v28_v9 = vrot.slane %v16_v6, 7  ;;  %v178_v16 = vmul.f32 %v16_v6, %v16_v6 }
   0x4   :  { %v180_v10 = vsel %vm179_vm0, %v177_v1, 0.0  ;;  %v25_v11 = vsub.f32 %v17_v2, %v21_v3  ;;  %v31_v12 = vsub.f32 %v17_v2, %v27_v4 }
   0x5   :  { %181 = vadd.xlane.f32.xlu0 %v180_v10  ;;  %v26_v13 = vsub.f32 %v18_v7, %v22_v8  ;;  %v32_v14 = vsub.f32 %v18_v7, %v28_v9 }
   0x6   :  { %v35_v15 = vrot.slane %v31_v12, 6  ;;  %v40_v17 = vsel %vm39_vm1, %v25_v11, %v27_v4 }
   0x7   :  { %8 = vsyncpa [#allocation3], 0  ;;  %v36_v18 = vrot.slane %v32_v14, 6  ;;  %v46_v19 = vrot.slane %v40_v17, 6  ;;  %v41_v20 = vsel %vm39_vm1, %v26_v13, %v28_v9  ;;  %v183_v26 = vsel %vm179_vm0, %v178_v16, 0.0  ;;  %s421_s19 = smov 10  }
   0x8   :  { %v42_v21 = vsel %vm39_vm1, %v27_v4, %v35_v15  ;;  %v47_v22 = vrot.slane %v41_v20, 6  ;;  %vm84_vm2 = vcmask 1046528   ;;  %vm115_vm3 = vcmask 48130   ;;  %v361_v11 = vld [vmem:[%s499_s2 + $0x1] ss:$0 sm:$0xff]  ;;  %s422_s24 = smov 20  }
   0x9   :  { %v50_v23 = vsub.f32 %v40_v17, %v46_v19  ;;  %v51_v24 = vsub.f32 %v42_v21, %v46_v19  ;;  %v43_v25 = vsel %vm39_vm1, %v28_v9, %v36_v18  ;;  %vm119_vm4 = vcmask 41984   ;;  %v360_v9 = vld [vmem:[%s498_s1 + $0x1] ss:$0 sm:$0xff]  ;;  %s336_s4 = sshll.u32 %s500_s3, 4  ;;  %s424_s5 = smov 128   ;;  %s337_s4 = int_to_ptr.hbm [resolvable:$true] %s336_s4 }
   0xa   :  { %v52_v27 = vsub.f32 %v41_v20, %v47_v22  ;;  %v53_v28 = vsub.f32 %v43_v25, %v47_v22  ;;  %249 = vperm.xlu1 %358, %v16_v6   ;;  %s425_s6 = smov 8  }
   0xb   :  { %v54_v29 = vmul.f32 0.5, %v50_v23  ;;  %v55_v30 = vmul.f32 0.5, %v51_v24 }
   0xc   :  { %v56_v31 = vmul.f32 0.5, %v52_v27  ;;  %v57_v32 = vmul.f32 0.5, %v53_v28 }
   0xd   :  { %184 = vadd.xlane.f32.xlu0 %v183_v26  ;;  %v58_v33 = vmul.f32 2.0, %v54_v29  ;;  %v62_v34 = vrot.slane %v54_v29, 1  ;;  %v85_v35 = vrot.slane %v55_v30, 1  ;;  %v68_v36 = vmul.f32 2.0, %v55_v30 }
   0xe   :  { %v72_v37 = vrot.slane %v55_v30, 7  ;;  %v59_v38 = vmul.f32 2.0, %v56_v31  ;;  %v63_v39 = vrot.slane %v56_v31, 1  ;;  %v87_v41 = vrot.slane %v57_v32, 1 }
   0xf   :  { %v66_v40 = vsub.f32 %v58_v33, %v62_v34  ;;  %v86_v42 = vsel %vm84_vm2, %v62_v34, %v85_v35  ;;  %v69_v60 = vmul.f32 2.0, %v57_v32  ;;  %v73_v61 = vrot.slane %v57_v32, 7 }
  0x10   :  { %v76_v43 = vsub.f32 %v68_v36, %v72_v37  ;;  %v67_v44 = vsub.f32 %v59_v38, %v63_v39  ;;  %v88_v46 = vsel %vm84_vm2, %v63_v39, %v87_v41  ;;  %v362_v36 = vld [vmem:[%s498_s1 + $0x2] ss:$0 sm:$0xff]  ;;  %vm319_vm2 = vcmask 162816  }
  0x11   :  { %v80_v45 = vrot.slane %v66_v40, 2  ;;  %v77_v2 = vsub.f32 %v69_v60, %v73_v61 }
  0x12   :  { %v81_v47 = vrot.slane %v67_v44, 2  ;;  %v95_v49 = vsel %vm39_vm1, %v85_v35, %v76_v43 }
  0x13   :  { %v93_v48 = vsel %vm39_vm1, %v80_v45, %v86_v42  ;;  %v96_v4 = vsel %vm39_vm1, %v87_v41, %v77_v2  ;;  %v363_v41 = vld [vmem:[%s499_s2 + $0x2] ss:$0 sm:$0xff] }
  0x14   :  { %v99_v50 = vrot.slane %v93_v48, 6  ;;  %v94_v51 = vsel %vm39_vm1, %v81_v47, %v88_v46  ;;  %vm314_vm1 = vcmask 80896  }
  0x15   :  { %v100_v52 = vrot.slane %v94_v51, 6 }
  0x16   :  { %v103_v53 = vsub.f32 %v93_v48, %v99_v50  ;;  %v104_v54 = vsub.f32 %v95_v49, %v99_v50 }
  0x17   :  { %v105_v55 = vsub.f32 %v94_v51, %v100_v52  ;;  %v106_v5 = vsub.f32 %v96_v4, %v100_v52 }
  0x18   :  { %v107_v56 = vmul.f32 0.5, %v103_v53  ;;  %v108_v59 = vmul.f32 0.5, %v104_v54 }
  0x19   :  { %v109_v57 = vmul.f32 0.5, %v105_v55  ;;  %v110_v6 = vmul.f32 0.5, %v106_v5 }
  0x1a   :  { %v111_v58 = vmul.f32 %v107_v56, %v107_v56  ;;  %v112_v1 = vmul.f32 %v108_v59, %v108_v59 }
  0x1b   :  { %v113_v62 = vmul.f32 %v109_v57, %v109_v57  ;;  %v114_v7 = vmul.f32 %v110_v6, %v110_v6 }
  0x1c   :  { %v116_v63 = vsel %vm115_vm3, %v111_v58, 0.0  ;;  %v120_v3 = vsel %vm119_vm4, %v112_v1, 0.0 }
  0x1d   :  { %117 = vadd.xlane.f32.xlu2 %v116_v63  ;;  %v123_v0 = vsel %vm115_vm3, %v113_v62, 0.0  ;;  %v126_v8 = vsel %vm119_vm4, %v114_v7, 0.0  ;;  %vm324_vm3 = vcmask 244738   ;;  %vm326_vm4 = vcmask 238592  }
  0x1e   :  { %124 = vadd.xlane.f32.xlu0 %v123_v0 }
  0x25   :  { %121 = vadd.xlane.f32.xlu2 %v120_v3 }
  0x34   :  { %127 = vadd.xlane.f32.xlu1 %v126_v8 }
  0x74   :  { %v246_v10 = vpop.permute.xlu1 %245 }
  0x75   :  { %v255_v12 = vmul.f32 %v360_v9, %v246_v10 }
  0x77   :  { %v262_v14 = vsub.f32 %v255_v12, %v361_v11 }
  0x78   :  { %v182_v13 = vpop.xlane.xlu0 %181 }
  0x79   :  { %366 = vrsqrt.f32 %v182_v13  ;;  %v264_v15 = vmul.f32 0.5, %v262_v14  ;;  %vm193_vm5 = vcmp.eq.f32.partialorder %v182_v13, inf  ;;  %v196_v38 = vand.u32 2147483648, %v182_v13 }
  0x7a   :  { %vm195_vm6 = vcmp.eq.f32.partialorder %v182_v13, 0.0 }
  0x7b   :  { %368 = vtanh.f32 %v264_v15 }
  0x7c   :  { %v250_v16 = vpop.permute.xlu1 %249 }
  0x7d   :  { %v256_v17 = vmul.f32 %v360_v9, %v250_v16 }
  0x7f   :  { %v367_v18 = vpop.eup %366  ;;  %v263_v21 = vsub.f32 %v256_v17, %v361_v11 }
  0x80   :  { %v187_v19 = vmul.f32 %v367_v18, %v182_v13  ;;  %v185_v20 = vpop.xlane.xlu0 %184 }
  0x81   :  { %370 = vrsqrt.f32 %v185_v20  ;;  %v369_v22 = vpop.eup %368  ;;  %v265_v24 = vmul.f32 0.5, %v263_v21  ;;  %vm205_vm7 = vcmp.eq.f32.partialorder %v185_v20, inf  ;;  %v208_v51 = vand.u32 2147483648, %v185_v20 }
  0x82   :  { %v188_v23 = vmul.f32 %v367_v18, %v187_v19  ;;  %v268_v25 = vadd.f32 1.0, %v369_v22  ;;  %vm207_vm8 = vcmp.eq.f32.partialorder %v185_v20, 0.0 }
  0x83   :  { %372 = vtanh.f32 %v265_v24 }
  0x84   :  { %v189_v26 = vmul.f32 0.5, %v188_v23  ;;  %v270_v27 = vmul.f32 0.5, %v268_v25  ;;  %v364_v23 = vld [vmem:[%s498_s1] ss:$0 sm:$0xff]  ;;  %s423_s1 = smov [#allocation2]  }
  0x86   :  { %v190_v28 = vsub.f32 1.5, %v189_v26  ;;  %v296_v30 = vrot.slane %v270_v27, 6 }
  0x87   :  { %v371_v29 = vpop.eup %370 }
  0x88   :  { %v191_v31 = vmul.f32 %v367_v18, %v190_v28  ;;  %v199_v32 = vmul.f32 %v371_v29, %v185_v20  ;;  %298 = vrot.lane.b32.xlu2 %v296_v30, %s421_s19 }
  0x89   :  { %v373_v33 = vpop.eup %372 }
  0x8a   :  { %v192_v34 = vmul.f32 %v191_v31, %v182_v13  ;;  %v200_v35 = vmul.f32 %v371_v29, %v199_v32  ;;  %v269_v37 = vadd.f32 1.0, %v373_v33 }
  0x8c   :  { %v201_v39 = vmul.f32 0.5, %v200_v35  ;;  %v194_v40 = vsel %vm193_vm5, %v182_v13, %v192_v34  ;;  %v271_v42 = vmul.f32 0.5, %v269_v37 }
  0x8d   :  { %v197_v43 = vsel %vm195_vm6, %v196_v38, %v194_v40 }
  0x8e   :  { %v202_v44 = vsub.f32 1.5, %v201_v39  ;;  %v277_v45 = vmul.f32 %v362_v36, %v197_v43  ;;  %v297_v46 = vrot.slane %v271_v42, 6 }
  0x90   :  { %v203_v47 = vmul.f32 %v371_v29, %v202_v44  ;;  %v284_v48 = vsub.f32 %v277_v45, %v363_v41  ;;  %300 = vrot.lane.b32.xlu0 %v297_v46, %s421_s19  ;;  %v118_v1 = vpop.xlane.xlu2 %117  ;;  %v365_v29 = vld [vmem:[%s499_s2] ss:$0 sm:$0xff]  ;;  %s334_s2 = sshll.u32 %s423_s1, 4  ;;  %s335_s2 = int_to_ptr.vmem [resolvable:$true] %s334_s2 }
  0x91   :  { %v125_v16 = vpop.xlane.xlu0 %124  ;;  %vm136_vm9 = vcmp.eq.f32.partialorder %v118_v1, inf  ;;  %v139_v19 = vand.u32 2147483648, %v118_v1  ;;  %vm138_vm11 = vcmp.eq.f32.partialorder %v118_v1, 0.0 }
  0x92   :  { %v204_v49 = vmul.f32 %v203_v47, %v185_v20  ;;  %v286_v50 = vmul.f32 0.5, %v284_v48  ;;  %vm160_vm13 = vcmp.eq.f32.partialorder %v125_v16, inf  ;;  %vm162_vm15 = vcmp.eq.f32.partialorder %v125_v16, 0.0 }
  0x94   :  { %374 = vtanh.f32 %v286_v50  ;;  %v206_v52 = vsel %vm205_vm7, %v185_v20, %v204_v49 }
  0x95   :  { %v209_v53 = vsel %vm207_vm8, %v208_v51, %v206_v52 }
  0x96   :  { %v278_v54 = vmul.f32 %v362_v36, %v209_v53  ;;  %v163_v53 = vand.u32 2147483648, %v125_v16 }
  0x98   :  { %v285_v55 = vsub.f32 %v278_v54, %v363_v41  ;;  %v122_v2 = vpop.xlane.xlu2 %121 }
  0x99   :  { %vm148_vm10 = vcmp.eq.f32.partialorder %v122_v2, inf  ;;  %v151_v20 = vand.u32 2147483648, %v122_v2  ;;  %vm150_vm12 = vcmp.eq.f32.partialorder %v122_v2, 0.0 }
  0x9a   :  { %v375_v56 = vpop.eup %374  ;;  %v287_v57 = vmul.f32 0.5, %v285_v55 }
  0x9b   :  { %v290_v58 = vadd.f32 1.0, %v375_v56 }
  0x9c   :  { %376 = vtanh.f32 %v287_v57 }
  0x9d   :  { %v292_v59 = vmul.f32 0.5, %v290_v58  ;;  %378 = vrsqrt.f32 %v118_v1 }
  0x9e   :  { %380 = vrsqrt.f32 %v122_v2 }
  0x9f   :  { %v306_v60 = vrot.slane %v292_v59, 6  ;;  %382 = vrsqrt.f32 %v125_v16 }
  0xa1   :  { %308 = vrot.lane.b32.xlu2 %v306_v60, %s422_s24 }
  0xa2   :  { %v377_v61 = vpop.eup %376 }
  0xa3   :  { %v291_v62 = vadd.f32 1.0, %v377_v61  ;;  %v379_v3 = vpop.eup %378 }
  0xa4   :  { %v381_v4 = vpop.eup %380  ;;  %v130_v5 = vmul.f32 %v379_v3, %v118_v1 }
  0xa5   :  { %v293_v63 = vmul.f32 0.5, %v291_v62  ;;  %v142_v6 = vmul.f32 %v381_v4, %v122_v2  ;;  %v383_v26 = vpop.eup %382 }
  0xa6   :  { %v131_v7 = vmul.f32 %v379_v3, %v130_v5  ;;  %v154_v31 = vmul.f32 %v383_v26, %v125_v16 }
  0xa7   :  { %v307_v0 = vrot.slane %v293_v63, 6  ;;  %v143_v8 = vmul.f32 %v381_v4, %v142_v6  ;;  %v128_v18 = vpop.xlane.xlu1 %127 }
  0xa8   :  { %v132_v9 = vmul.f32 0.5, %v131_v7  ;;  %384 = vrsqrt.f32 %v128_v18  ;;  %v155_v35 = vmul.f32 %v383_v26, %v154_v31  ;;  %vm172_vm14 = vcmp.eq.f32.partialorder %v128_v18, inf }
  0xa9   :  { %310 = vrot.lane.b32.xlu0 %v307_v0, %s422_s24  ;;  %v144_v10 = vmul.f32 0.5, %v143_v8  ;;  %v175_v52 = vand.u32 2147483648, %v128_v18  ;;  %vm174_vm0 = vcmp.eq.f32.partialorder %v128_v18, 0.0 }
  0xaa   :  { %v133_v11 = vsub.f32 1.5, %v132_v9  ;;  %v156_v39 = vmul.f32 0.5, %v155_v35 }
  0xab   :  { %v145_v12 = vsub.f32 1.5, %v144_v10 }
  0xac   :  { %v134_v13 = vmul.f32 %v379_v3, %v133_v11  ;;  %v157_v41 = vsub.f32 1.5, %v156_v39 }
  0xad   :  { %v146_v14 = vmul.f32 %v381_v4, %v145_v12 }
  0xae   :  { %v135_v15 = vmul.f32 %v134_v13, %v118_v1  ;;  %v385_v27 = vpop.eup %384  ;;  %v158_v44 = vmul.f32 %v383_v26, %v157_v41 }
  0xaf   :  { %v147_v17 = vmul.f32 %v146_v14, %v122_v2  ;;  %v166_v32 = vmul.f32 %v385_v27, %v128_v18 }
  0xb0   :  { %v137_v21 = vsel %vm136_vm9, %v118_v1, %v135_v15  ;;  %v159_v48 = vmul.f32 %v158_v44, %v125_v16 }
  0xb1   :  { %v149_v22 = vsel %vm148_vm10, %v122_v2, %v147_v17  ;;  %v140_v24 = vsel %vm138_vm11, %v139_v19, %v137_v21  ;;  %v167_v36 = vmul.f32 %v385_v27, %v166_v32 }
  0xb2   :  { %v152_v25 = vsel %vm150_vm12, %v151_v20, %v149_v22  ;;  %v214_v28 = vmul.f32 %v364_v23, %v140_v24  ;;  %v161_v56 = vsel %vm160_vm13, %v125_v16, %v159_v48 }
  0xb3   :  { %v215_v30 = vmul.f32 %v364_v23, %v152_v25  ;;  %v168_v40 = vmul.f32 0.5, %v167_v36  ;;  %v164_v58 = vsel %vm162_vm15, %v163_v53, %v161_v56 }
  0xb4   :  { %v222_v33 = vsub.f32 %v214_v28, %v365_v29  ;;  %v216_v1 = vmul.f32 %v364_v23, %v164_v58 }
  0xb5   :  { %v223_v34 = vsub.f32 %v215_v30, %v365_v29  ;;  %v169_v42 = vsub.f32 1.5, %v168_v40 }
  0xb6   :  { %v226_v37 = vmul.f32 0.5, %v222_v33  ;;  %v224_v3 = vsub.f32 %v216_v1, %v365_v29 }
  0xb7   :  { %v227_v38 = vmul.f32 0.5, %v223_v34  ;;  %v170_v46 = vmul.f32 %v385_v27, %v169_v42 }
  0xb8   :  { %386 = vtanh.f32 %v226_v37  ;;  %v228_v5 = vmul.f32 0.5, %v224_v3 }
  0xb9   :  { %388 = vtanh.f32 %v227_v38  ;;  %v171_v51 = vmul.f32 %v170_v46, %v128_v18 }
  0xba   :  { %390 = vtanh.f32 %v228_v5 }
  0xbb   :  { %v173_v57 = vsel %vm172_vm14, %v128_v18, %v171_v51 }
  0xbc   :  { %v176_v62 = vsel %vm174_vm0, %v175_v52, %v173_v57 }
  0xbd   :  { %v217_v2 = vmul.f32 %v364_v23, %v176_v62 }
  0xbe   :  { %v387_v43 = vpop.eup %386 }
  0xbf   :  { %v389_v45 = vpop.eup %388  ;;  %v234_v49 = vadd.f32 1.0, %v387_v43  ;;  %v225_v4 = vsub.f32 %v217_v2, %v365_v29 }
  0xc0   :  { %v235_v50 = vadd.f32 1.0, %v389_v45  ;;  %v391_v7 = vpop.eup %390 }
  0xc1   :  { %v238_v54 = vmul.f32 0.5, %v234_v49  ;;  %v229_v6 = vmul.f32 0.5, %v225_v4  ;;  %v236_v9 = vadd.f32 1.0, %v391_v7 }
  0xc2   :  { %v239_v55 = vmul.f32 0.5, %v235_v50 }
  0xc3   :  { %392 = vtanh.f32 %v229_v6  ;;  %v240_v12 = vmul.f32 0.5, %v236_v9 }
  0xc9   :  { %v393_v8 = vpop.eup %392 }
  0xca   :  { %v237_v10 = vadd.f32 1.0, %v393_v8 }
  0xcc   :  { %v241_v13 = vmul.f32 0.5, %v237_v10 }
  0xe2   :  { %v299_v47 = vpop.permute.xlu2 %298 }
  0xe3   :  { %v315_v59 = vsel %vm314_vm1, %v238_v54, %v299_v47  ;;  %v316_v60 = vsel %vm314_vm1, %v239_v55, %v299_v47 }
  0xfb   :  { %v309_v61 = vpop.permute.xlu2 %308 }
  0xfc   :  { %v320_v63 = vsel %vm319_vm2, %v315_v59, %v309_v61  ;;  %v321_v0 = vsel %vm319_vm2, %v316_v60, %v309_v61 }
  0xfd   :  { %325 = vst.msk [vmem:[#allocation2 - $0x2] sm:$0xfc] %vm324_vm3, %v320_v63 }
  0xfe   :  { %327 = vst.msk [vmem:[#allocation2 + $0x6] sm:$0x3] %vm326_vm4, %v321_v0 }
 0x102   :  { %v301_v11 = vpop.permute.xlu0 %300 }
 0x103   :  { %v317_v14 = vsel %vm314_vm1, %v240_v12, %v301_v11  ;;  %v318_v15 = vsel %vm314_vm1, %v241_v13, %v301_v11 }
 0x11b   :  { %v311_v16 = vpop.permute.xlu0 %310 }
 0x11c   :  { %v322_v17 = vsel %vm319_vm2, %v317_v14, %v311_v16  ;;  %v323_v18 = vsel %vm319_vm2, %v318_v15, %v311_v16 }
 0x11d   :  { %328 = vst.msk [vmem:[#allocation2 + $0x6] sm:$0xfc] %vm324_vm3, %v322_v17 }
 0x11e   :  { %329 = vst.msk [vmem:[#allocation2 + $0xe] sm:$0x3] %vm326_vm4, %v323_v18 }
 0x11f   :  { %342 = dma.vmem_to_hbm [thread:$0]  %s335_s2, 256, %s337_s4, [#allocation3], %s424_s5, %s424_s5, %s425_s6  }
 0x120   :  { %418 = dma.done.wait [#allocation3], 256  }
 0x121   :  { %419 = vsyncadd [#allocation3], 4294967040 }
 0x122   :  { %347 = vsyncpa [#allocation3], 1 }

</bundles_post_ra>
